<compile_context>
chip_gen: v7x
topology: tpu7x:2x2x1
jax: 0.10.0
libtpu: 0.0.40
codegen_flags: <defaults>
</compile_context>

<pallas_src>
import jax
import jax.numpy as jnp
from jax.experimental import pallas as pl
from jax.experimental.pallas import tpu as pltpu


def _freq_gain_kernel(x_ref, scale_ref, o_ref):
    # x_ref:     (tile_bc, tile_ft) activation slab
    # scale_ref: (1, tile_ft) f32 gain row -> broadcast over sublanes (cheap)
    # o_ref:     (tile_bc, tile_ft)
    x = x_ref[...]
    o_ref[...] = (x.astype(jnp.float32) * scale_ref[...]).astype(o_ref.dtype)


def freq_gain(x, scale, *, target_block_bytes=8 * 1024 * 1024,
              vmem_limit_bytes=48 * 1024 * 1024):
    """FreqGain forward: x * scale.

    x:     (B, C, F, T)
    scale: (1, 1, F, 1) learnable per-frequency gain (kept in f32).
    """
    B, C, F, T = x.shape
    assert scale.shape == (1, 1, F, 1), scale.shape

    BC, FT = B * C, F * T
    x2 = x.reshape(BC, FT)
    # Broadcast the per-frequency gain across time once in the wrapper so the
    # kernel sees a plain (1, tile_ft) row.  Cost: F*T*4 bytes in HBM, which is
    # negligible next to x, and it is fetched once per FT-block (outer axis).
    scale_row = jnp.broadcast_to(
        scale.reshape(F, 1).astype(jnp.float32), (F, T)).reshape(1, FT)

    itemsize = jnp.dtype(x.dtype).itemsize
    # Sublane packing granularity is dtype dependent: 8 (f32), 16 (bf16), 32 (int8/fp8).
    sub_step = {4: 8, 2: 16, 1: 32}.get(itemsize, 8)

    # --- lane (last-dim) tile --------------------------------------------------
    min_bc = min(BC, sub_step)
    ft_budget = max(target_block_bytes // (min_bc * itemsize), 128)
    if FT <= ft_budget:
        tile_ft = FT                         # full dim: any size is legal
    else:
        tile_ft = (ft_budget // 128) * 128   # multiple of 128 lanes; ragged edge ok

    # --- sublane (second-to-last) tile ----------------------------------------
    bc_budget = max(target_block_bytes // (tile_ft * itemsize), 1)
    if bc_budget >= BC:
        tile_bc = BC                         # full dim: any size is legal
    else:
        tile_bc = max((bc_budget // sub_step) * sub_step, sub_step)

    # Ragged-tolerant grid (Pallas masks edge blocks; safe for elementwise).
    # FT is the outer axis, BC the inner axis, so the scale block index stays
    # constant across the fast-iterating inner steps and is not re-fetched.
    grid = (pl.cdiv(FT, tile_ft), pl.cdiv(BC, tile_bc))

    out2 = pl.pallas_call(
        _freq_gain_kernel,
        out_shape=jax.ShapeDtypeStruct((BC, FT), x.dtype),
        grid_spec=pltpu.PrefetchScalarGridSpec(
            num_scalar_prefetch=0,
            grid=grid,
            in_specs=[
                pl.BlockSpec((tile_bc, tile_ft), lambda ft, bc: (bc, ft)),
                pl.BlockSpec((1, tile_ft), lambda ft, bc: (0, ft)),
            ],
            out_specs=pl.BlockSpec((tile_bc, tile_ft), lambda ft, bc: (bc, ft)),
        ),
        compiler_params=pltpu.CompilerParams(
            dimension_semantics=("parallel", "parallel"),
            vmem_limit_bytes=vmem_limit_bytes,
        ),
    )(x2, scale_row)
    return out2.reshape(B, C, F, T)


if __name__ == "__main__":
    key = jax.random.PRNGKey(0)
    kx1, ks1, kx2, ks2 = jax.random.split(key, 4)

    # Case 1: small, "nice" shape (single large block).
    B, C, F, T = 2, 4, 16, 16
    x = jax.random.normal(kx1, (B, C, F, T), dtype=jnp.float32)
    # The torch module initializes scale to ones; use random values so the
    # per-frequency broadcast is actually exercised.
    scale = jax.random.normal(ks1, (1, 1, F, 1), dtype=jnp.float32)
    out = jax.block_until_ready(freq_gain(x, scale))
    ref = x * scale
    assert out.shape == (B, C, F, T), out.shape
    assert jnp.allclose(out, ref, atol=1e-6, rtol=1e-6), "case 1 mismatch"

    # Case 2: awkward, non-divisible shape with a tiny block budget to force
    # multi-block tiling and the masked ragged-edge path.
    B2, C2, F2, T2 = 3, 2, 20, 50
    x2 = jax.random.normal(kx2, (B2, C2, F2, T2), dtype=jnp.float32)
    scale2 = jax.random.normal(ks2, (1, 1, F2, 1), dtype=jnp.float32)
    out2 = jax.block_until_ready(
        freq_gain(x2, scale2, target_block_bytes=4096))
    ref2 = x2 * scale2
    assert out2.shape == (B2, C2, F2, T2), out2.shape
    assert jnp.allclose(out2, ref2, atol=1e-6, rtol=1e-6), "case 2 mismatch"

    print("KERNEL_OK")
</pallas_src>

<mosaic_0001>
module attributes {stable_mosaic.version = 11 : i64} {
  func.func @_freq_gain_kernel(%arg0: i32, %arg1: i32, %arg2: memref<8x256xf32, #tpu.memory_space<vmem>>, %arg3: memref<1x256xf32, #tpu.memory_space<vmem>>, %arg4: memref<8x256xf32, #tpu.memory_space<vmem>>) attributes {dimension_semantics = [#tpu.dimension_semantics<parallel>, #tpu.dimension_semantics<parallel>], iteration_bounds = array<i64: 1, 1>, scalar_prefetch = 0 : i64, scratch_operands = 0 : i64, tpu.core_type = #tpu.core_type<tc>, window_params = [{transform_indices = @transform_0, window_bounds = array<i64: 8, 256>}, {transform_indices = @transform_1, window_bounds = array<i64: 1, 256>}, {transform_indices = @transform_2, window_bounds = array<i64: 8, 256>}]} {
    %c0 = arith.constant 0 : index
    %c0_0 = arith.constant 0 : index
    %0 = vector.load %arg2[%c0, %c0_0] : memref<8x256xf32, #tpu.memory_space<vmem>>, vector<8x256xf32>
    %c0_1 = arith.constant 0 : index
    %c0_2 = arith.constant 0 : index
    %1 = vector.load %arg3[%c0_1, %c0_2] : memref<1x256xf32, #tpu.memory_space<vmem>>, vector<1x256xf32>
    %2 = vector.broadcast %1 : vector<1x256xf32> to vector<8x256xf32>
    %3 = arith.mulf %0, %2 : vector<8x256xf32>
    %c0_3 = arith.constant 0 : index
    %c0_4 = arith.constant 0 : index
    %4 = vector.load %arg4[%c0_3, %c0_4] : memref<8x256xf32, #tpu.memory_space<vmem>>, vector<8x256xf32>
    tpu.vector_store %arg4[%c0_3, %c0_4], %3 {strides = array<i32>} : memref<8x256xf32, #tpu.memory_space<vmem>>, vector<8x256xf32>,
    return
  }
  func.func @transform_0(%arg0: i32, %arg1: i32) -> (i32, i32) {
    %c0_i32 = arith.constant 0 : i32
    return %arg1, %arg0 : i32, i32
  }
  func.func @transform_1(%arg0: i32, %arg1: i32) -> (i32, i32) {
    %c0_i32 = arith.constant 0 : i32
    %c0_i32_0 = arith.constant 0 : i32
    return %c0_i32, %arg0 : i32, i32
  }
  func.func @transform_2(%arg0: i32, %arg1: i32) -> (i32, i32) {
    %c0_i32 = arith.constant 0 : i32
    return %arg1, %arg0 : i32, i32
  }
}

</mosaic_0001>

<bundles_post_ra>
// kernel: tpu_custom_call.1
= control target key start
LH: loop header
LB: loop body
LE: loop exit
PB: predicated region body
PF: predicated region fallthrough
CT: control target
= control target key end

     0   :  { %7 = vsyncpa [#allocation3], 0  ;;  %s151_s0 = inlined_call_operand.hbm [shape: f32[8,256], index: 0, kind: input, shape index: {}]   ;;  %s152_s1 = inlined_call_operand.vmem [shape: f32[1,256], index: 1, kind: input, shape index: {}]   ;;  %s153_s2 = inlined_call_operand.hbm [shape: f32[8,256], index: 2, kind: output, shape index: {}]  }
   0x1   :  { %8 = vsyncpa [#allocation4], 0  ;;  %s107_s9 = smov [#allocation2]   ;;  %s59_s13 = scalar_lea.hbm %s151_s0, 256 }
   0x2   :  { %s15_s10 = sshll.u32 %s107_s9, 4  ;;  %p60_p0 = scmp.ne.s32.totalorder %s151_s0, %s59_s13  ;;  %s16_s10 = int_to_ptr.vmem [resolvable:$true] %s15_s10 }
   0x3   :  { %p63_p1 = scmp.lt.u32.totalorder %s59_s13, %s151_s0 }
   0x5   :  { %p65_p2 = pnand %p63_p1, %p60_p0 }
   0x7   :  { %68 = shalt.err (!%p65_p2)
}
   0x8   :  { %s69_s18 = scalar_lea.vmem %s16_s10, 256  ;;  %p74_p4 = scmp.lt.s32.totalorder %s16_s10, %s16_s10 }
   0x9   :  { %p70_p3 = scmp.ne.s32.totalorder %s16_s10, %s69_s18  ;;  %p75_p5 = scmp.lt.s32.totalorder %s69_s18, %s69_s18 }
   0xb   :  { %p76_p6 = por %p75_p5, %p74_p4 }
   0xd   :  { %p77_p7 = pnand %p76_p6, %p70_p3 }
   0xf   :  { %80 = shalt.err (!%p77_p7)
}
  0x10   :  { %18 = dma.hbm_to_vmem [thread:$0]  %s151_s0, 256, %s16_s10, [#allocation3]  }
  0x11   :  { %103 = dma.done.wait [#allocation3], 256  }
  0x12   :  { %104 = vsyncadd [#allocation3], 4294967040  ;;  %v28_v0 = vlaneseq  ;;  %v24_v4 = vld [vmem:[#allocation2] sm:$0xff]  ;;  %v25_v6 = vld [vmem:[#allocation2 + $0x8] sm:$0xff]  ;;  %s108_s23 = smov [#allocation5]  }
  0x13   :  { %v26_v5 = vld [vmem:[%s152_s1] sm:$0x3]  ;;  %s48_s24 = sshll.u32 %s108_s23, 4  ;;  %s49_s24 = int_to_ptr.vmem [resolvable:$true] %s48_s24 }
  0x14   :  { %v29_v1 = vshrl.u32 %v28_v0, 7  ;;  %s81_s0 = scalar_lea.vmem %s49_s24, 256  ;;  %p86_p9 = scmp.lt.s32.totalorder %s49_s24, %s49_s24 }
  0x15   :  { %p82_p8 = scmp.ne.s32.totalorder %s49_s24, %s81_s0  ;;  %p87_p10 = scmp.lt.s32.totalorder %s81_s0, %s81_s0 }
  0x16   :  { %v30_v2 = vsub.s32 0, %v29_v1  ;;  %v34_v3 = vsub.s32 1, %v29_v1 }
  0x17   :  { %p88_p11 = por %p87_p10, %p86_p9 }
  0x18   :  { %v31_v7 = vrot.slane %v26_v5, %v30_v2  ;;  %v35_v8 = vrot.slane %v26_v5, %v34_v3 }
  0x19   :  { %p89_p12 = pnand %p88_p11, %p82_p8 }
  0x1a   :  { %v38_v9 = vmul.f32 %v31_v7, %v24_v4  ;;  %v39_v10 = vmul.f32 %v35_v8, %v25_v6 }
  0x1c   :  { %40 = vst [vmem:[#allocation5] sm:$0xff] %v38_v9  ;;  %41 = vst [vmem:[#allocation5 + $0x8] sm:$0xff] %v39_v10 }
  0x1d   :  { %92 = shalt.err (!%p89_p12)
}
  0x1e   :  { %s93_s1 = scalar_lea.hbm %s153_s2, 256 }
  0x1f   :  { %p94_p13 = scmp.ne.s32.totalorder %s153_s2, %s93_s1  ;;  %p97_p0 = scmp.lt.u32.totalorder %s93_s1, %s153_s2 }
  0x21   :  { %p99_p1 = pnand %p97_p0, %p94_p13 }
  0x23   :  { %102 = shalt.err (!%p99_p1)
}
  0x24   :  { %51 = dma.vmem_to_hbm [thread:$0]  %s49_s24, 256, %s153_s2, [#allocation4]  }
  0x25   :  { %105 = dma.done.wait [#allocation4], 256  }
  0x26   :  { %106 = vsyncadd [#allocation4], 4294967040 }
  0x27   :  { %55 = vsyncpa [#allocation3], 1 }
  0x28   :  { %56 = vsyncpa [#allocation4], 1 }

</bundles_post_ra>
